<compile_context>
chip_gen: v7x
topology: tpu7x:2x2x1
jax: 0.10.0
libtpu: 0.0.40
codegen_flags: <defaults>
</compile_context>

<pallas_src>
import jax
import jax.numpy as jnp
from jax.experimental import pallas as pl
from jax.experimental.pallas import tpu as pltpu


def _logreg_kernel(x_ref, w_ref, b_ref, o_ref, acc_ref):
    # x_ref: (TB, TD) VMEM, w_ref: (1, TD) VMEM, b_ref: (1, 1) SMEM
    # o_ref: (TB, 1), acc_ref: (TB, 1) f32 VMEM scratch (persists across grid).
    k = pl.program_id(1)

    @pl.when(k == 0)
    def _():
        acc_ref[...] = jnp.zeros_like(acc_ref)

    x = x_ref[...].astype(jnp.float32)
    w = w_ref[...].astype(jnp.float32)
    # Partial dot product: elementwise multiply (VPU) + lane reduce (XLU).
    acc_ref[...] += jnp.sum(x * w, axis=1, keepdims=True)

    @pl.when(k == pl.num_programs(1) - 1)
    def _():
        z = acc_ref[...] + b_ref[0, 0]
        # Sigmoid (exp lives in the otherwise idle EUP slot).
        o_ref[...] = (1.0 / (1.0 + jnp.exp(-z))).astype(o_ref.dtype)


def _round_up(x, m):
    return ((x + m - 1) // m) * m


def logistic_regression(x, weight, bias, *, max_tb=1024, max_td=1024):
    """x: (B, D), weight: (1, D), bias: (1,) -> (B, 1) sigmoid(x @ W^T + b)."""
    B, D = x.shape

    # Feature tile: multiple of 128 that divides D (so no garbage enters the
    # accumulator), otherwise fall back to the full feature dim.
    TD = D
    if D > max_td:
        for cand in (max_td, 512, 256, 128):
            if cand <= max_td and D % cand == 0:
                TD = cand
                break

    # Batch tile: multiple of 8, sized so 2 x (TB, TD) f32 double-buffered x
    # tiles stay under ~12 MiB (safe even for v5e's 16 MiB default scoped VMEM).
    vmem_budget = 12 * 1024 * 1024
    tb_fit = max(8, (vmem_budget // (2 * TD * 4)) // 8 * 8)
    TB = min(max_tb, tb_fit, _round_up(B, 8))

    nb = pl.cdiv(B, TB)
    nk = pl.cdiv(D, TD)

    b_smem = bias.reshape(1, 1).astype(jnp.float32)

    return pl.pallas_call(
        _logreg_kernel,
        out_shape=jax.ShapeDtypeStruct((B, 1), x.dtype),
        grid_spec=pltpu.PrefetchScalarGridSpec(
            num_scalar_prefetch=0,
            grid=(nb, nk),
            in_specs=[
                pl.BlockSpec((TB, TD), lambda i, k: (i, k)),   # x tiles
                pl.BlockSpec((1, TD), lambda i, k: (0, k)),    # weight tiles
                pl.BlockSpec(memory_space=pltpu.SMEM),         # bias scalar
            ],
            out_specs=pl.BlockSpec((TB, 1), lambda i, k: (i, 0)),
            scratch_shapes=[pltpu.VMEM((TB, 1), jnp.float32)],
        ),
        compiler_params=pltpu.CompilerParams(
            dimension_semantics=("parallel", "arbitrary"),
            vmem_limit_bytes=32 * 1024 * 1024,
        ),
    )(x, weight, b_smem)


def _reference(x, weight, bias):
    return jax.nn.sigmoid(x @ weight.T + bias)


if __name__ == "__main__":
    key = jax.random.PRNGKey(0)

    # --- Case 1: small shape matching the module spec ---------------------
    batch, input_dim = 8, 32
    kx, kw, kb, key = (*jax.random.split(key, 3), key)
    x = jax.random.normal(kx, (batch, input_dim), dtype=jnp.float32)
    bound = 1.0 / jnp.sqrt(jnp.float32(input_dim))
    weight = jax.random.uniform(kw, (1, input_dim), jnp.float32, -bound, bound)
    bias = jax.random.uniform(kb, (1,), jnp.float32, -bound, bound)

    out = jax.block_until_ready(logistic_regression(x, weight, bias))
    ref = _reference(x, weight, bias)
    assert out.shape == (batch, input_dim and 1)
    assert jnp.allclose(out, ref, atol=1e-5, rtol=1e-5), "mismatch (case 1)"

    # --- Case 2: exercise multi-tile batch (with padding) + K accumulation --
    batch2, input_dim2 = 300, 2048
    k1, k2, k3 = jax.random.split(jax.random.PRNGKey(1), 3)
    x2 = jax.random.normal(k1, (batch2, input_dim2), dtype=jnp.float32)
    bound2 = 1.0 / jnp.sqrt(jnp.float32(input_dim2))
    w2 = jax.random.uniform(k2, (1, input_dim2), jnp.float32, -bound2, bound2)
    b2 = jax.random.uniform(k3, (1,), jnp.float32, -bound2, bound2)

    out2 = jax.block_until_ready(
        logistic_regression(x2, w2, b2, max_tb=128, max_td=1024)
    )
    ref2 = _reference(x2, w2, b2)
    assert out2.shape == (batch2, 1)
    assert jnp.allclose(out2, ref2, atol=1e-5, rtol=1e-5), "mismatch (case 2)"

    print("KERNEL_OK")
</pallas_src>

<mosaic_0001>
module attributes {stable_mosaic.version = 11 : i64} {
  func.func @_logreg_kernel(%arg0: i32, %arg1: i32, %arg2: memref<8x32xf32, #tpu.memory_space<vmem>>, %arg3: memref<1x32xf32, #tpu.memory_space<vmem>>, %arg4: memref<1x1xf32, #tpu.memory_space<smem>>, %arg5: memref<8x1xf32, #tpu.memory_space<vmem>>, %arg6: memref<8x1xf32, #tpu.memory_space<vmem>>) attributes {dimension_semantics = [#tpu.dimension_semantics<parallel>, #tpu.dimension_semantics<arbitrary>], iteration_bounds = array<i64: 1, 1>, scalar_prefetch = 0 : i64, scratch_operands = 1 : i64, tpu.core_type = #tpu.core_type<tc>, window_params = [{transform_indices = @transform_0, window_bounds = array<i64: 8, 32>}, {transform_indices = @transform_1, window_bounds = array<i64: 1, 32>}, {transform_indices = @transform_2, window_bounds = array<i64: 1, 1>}, {transform_indices = @transform_3, window_bounds = array<i64: 8, 1>}]} {
    %c0_i32 = arith.constant 0 : i32
    %0 = arith.cmpi eq, %arg1, %c0_i32 : i32
    %1 = arith.extui %0 : i1 to i32
    %c0_i32_0 = arith.constant 0 : i32
    %2 = arith.cmpi ne, %1, %c0_i32_0 : i32
    scf.if %2 {
      %cst_10 = arith.constant 0.000000e+00 : f32
      %15 = vector.broadcast %cst_10 : f32 to vector<8x1xf32>
      %c0_11 = arith.constant 0 : index
      %c0_12 = arith.constant 0 : index
      %16 = vector.load %arg6[%c0_11, %c0_12] : memref<8x1xf32, #tpu.memory_space<vmem>>, vector<8x1xf32>
      tpu.vector_store %arg6[%c0_11, %c0_12], %15 {strides = array<i32>} : memref<8x1xf32, #tpu.memory_space<vmem>>, vector<8x1xf32>,
    } else {
    }
    %c0 = arith.constant 0 : index
    %c0_1 = arith.constant 0 : index
    %3 = vector.load %arg2[%c0, %c0_1] : memref<8x32xf32, #tpu.memory_space<vmem>>, vector<8x32xf32>
    %c0_2 = arith.constant 0 : index
    %c0_3 = arith.constant 0 : index
    %4 = vector.load %arg3[%c0_2, %c0_3] : memref<1x32xf32, #tpu.memory_space<vmem>>, vector<1x32xf32>
    %c0_4 = arith.constant 0 : index
    %c0_5 = arith.constant 0 : index
    %5 = vector.load %arg6[%c0_4, %c0_5] : memref<8x1xf32, #tpu.memory_space<vmem>>, vector<8x1xf32>
    %6 = vector.broadcast %4 : vector<1x32xf32> to vector<8x32xf32>
    %7 = arith.mulf %3, %6 : vector<8x32xf32>
    %cst = arith.constant dense<0.000000e+00> : vector<8xf32>
    %8 = vector.multi_reduction <add>, %7, %cst [1] : vector<8x32xf32> to vector<8xf32>
    %9 = vector.shape_cast %8 : vector<8xf32> to vector<8x1xf32>
    %10 = arith.addf %5, %9 : vector<8x1xf32>
    %c0_6 = arith.constant 0 : index
    %c0_7 = arith.constant 0 : index
    %11 = vector.load %arg6[%c0_6, %c0_7] : memref<8x1xf32, #tpu.memory_space<vmem>>, vector<8x1xf32>
    tpu.vector_store %arg6[%c0_6, %c0_7], %10 {strides = array<i32>} : memref<8x1xf32, #tpu.memory_space<vmem>>, vector<8x1xf32>,
    %c0_i32_8 = arith.constant 0 : i32
    %12 = arith.cmpi eq, %arg1, %c0_i32_8 : i32
    %13 = arith.extui %12 : i1 to i32
    %c0_i32_9 = arith.constant 0 : i32
    %14 = arith.cmpi ne, %13, %c0_i32_9 : i32
    scf.if %14 {
      %c0_10 = arith.constant 0 : index
      %c0_11 = arith.constant 0 : index
      %15 = vector.load %arg6[%c0_10, %c0_11] : memref<8x1xf32, #tpu.memory_space<vmem>>, vector<8x1xf32>
      %c0_12 = arith.constant 0 : index
      %c0_13 = arith.constant 0 : index
      %16 = memref.load %arg4[%c0_12, %c0_13] : memref<1x1xf32, #tpu.memory_space<smem>>
      %17 = vector.broadcast %16 : f32 to vector<8x1xf32>
      %18 = arith.addf %15, %17 : vector<8x1xf32>
      %cst_14 = arith.constant 0.000000e+00 : f32
      %19 = vector.broadcast %cst_14 : f32 to vector<8x1xf32>
      %20 = arith.subf %19, %18 : vector<8x1xf32>
      %21 = math.exp %20 : vector<8x1xf32>
      %cst_15 = arith.constant 1.000000e+00 : f32
      %22 = vector.broadcast %cst_15 : f32 to vector<8x1xf32>
      %23 = arith.addf %22, %21 : vector<8x1xf32>
      %cst_16 = arith.constant 1.000000e+00 : f32
      %24 = vector.broadcast %cst_16 : f32 to vector<8x1xf32>
      %25 = arith.divf %24, %23 : vector<8x1xf32>
      %c0_17 = arith.constant 0 : index
      %c0_18 = arith.constant 0 : index
      %26 = vector.load %arg5[%c0_17, %c0_18] : memref<8x1xf32, #tpu.memory_space<vmem>>, vector<8x1xf32>
      tpu.vector_store %arg5[%c0_17, %c0_18], %25 {strides = array<i32>} : memref<8x1xf32, #tpu.memory_space<vmem>>, vector<8x1xf32>,
    } else {
    }
    return
  }
  func.func @transform_0(%arg0: i32, %arg1: i32) -> (i32, i32) {
    %c0_i32 = arith.constant 0 : i32
    return %arg0, %arg1 : i32, i32
  }
  func.func @transform_1(%arg0: i32, %arg1: i32) -> (i32, i32) {
    %c0_i32 = arith.constant 0 : i32
    %c0_i32_0 = arith.constant 0 : i32
    return %c0_i32, %arg1 : i32, i32
  }
  func.func @transform_2(%arg0: i32, %arg1: i32) -> (i32, i32) {
    %c0_i32 = arith.constant 0 : i32
    %c0_i32_0 = arith.constant 0 : i32
    %c0_i32_1 = arith.constant 0 : i32
    return %c0_i32, %c0_i32_0 : i32, i32
  }
  func.func @transform_3(%arg0: i32, %arg1: i32) -> (i32, i32) {
    %c0_i32 = arith.constant 0 : i32
    %c0_i32_0 = arith.constant 0 : i32
    return %arg0, %c0_i32 : i32, i32
  }
}

</mosaic_0001>

<bundles_post_ra>
// kernel: tpu_custom_call.1
= control target key start
LH: loop header
LB: loop body
LE: loop exit
PB: predicated region body
PF: predicated region fallthrough
CT: control target
= control target key end

     0   :  { %9 = vsyncpa [#allocation5], 0  ;;  %s100_s12 = smov [#allocation4]   ;;  %s146_s0 = inlined_call_operand.hbm [shape: f32[8,32], index: 0, kind: input, shape index: {}]   ;;  %s147_s1 = inlined_call_operand.vmem [shape: f32[1,32], index: 1, kind: input, shape index: {}]   ;;  %s148_s2 = inlined_call_operand.<no memory space> [shape: f32[1,1], index: 2, kind: input, shape index: {}]   ;;  %s149_s3 = inlined_call_operand.vmem [shape: f32[8,1], index: 3, kind: output, shape index: {}]  }
   0x1   :  { %s16_s13 = sshll.u32 %s100_s12, 4  ;;  %s76_s16 = scalar_lea.hbm %s146_s0, 128  ;;  %s17_s13 = int_to_ptr.vmem [resolvable:$true] %s16_s13 }
   0x2   :  { %p77_p0 = scmp.ne.s32.totalorder %s146_s0, %s76_s16  ;;  %p80_p1 = scmp.lt.u32.totalorder %s76_s16, %s146_s0 }
   0x4   :  { %p82_p2 = pnand %p80_p1, %p77_p0 }
   0x6   :  { %85 = shalt.err (!%p82_p2)
}
   0x7   :  { %s86_s21 = scalar_lea.vmem %s17_s13, 128  ;;  %p91_p4 = scmp.lt.s32.totalorder %s17_s13, %s17_s13 }
   0x8   :  { %p87_p3 = scmp.ne.s32.totalorder %s17_s13, %s86_s21  ;;  %p92_p5 = scmp.lt.s32.totalorder %s86_s21, %s86_s21 }
   0xa   :  { %p93_p6 = por %p92_p5, %p91_p4 }
   0xc   :  { %p94_p7 = pnand %p93_p6, %p87_p3 }
   0xe   :  { %97 = shalt.err (!%p94_p7)
}
   0xf   :  { %19 = dma.hbm_to_vmem [thread:$0]  %s146_s0, 128, %s17_s13, [#allocation5]  }
  0x10   :  { %98 = dma.done.wait [#allocation5], 128  }
  0x11   :  { %99 = vsyncadd [#allocation5], 4294967168  ;;  %vm31_vm0 = vcmask 7168   ;;  %v101_v0 = vmov 0.0   ;;  %v33_v1 = vld [vmem:[#allocation4] sm:$0xff]  ;;  %vm43_vm1 = vcmask 261120   ;;  %v55_v8 = vstv %s148_s2 }
  0x12   :  { %32 = vst.msk [vmem:[#allocation2] sm:$0xff] %vm31_vm0, %v101_v0  ;;  %v69_v2 = vld [vmem:[%s147_s1] ss:$0 sm:$0xff] }
  0x13   :  { %v42_v3 = vmul.f32 %v69_v2, %v33_v1 }
  0x15   :  { %v44_v4 = vsel %vm43_vm1, %v42_v3, 0.0 }
  0x16   :  { %45 = vadd.xlane.f32.xlu0 %v44_v4 }
  0x19   :  { %v35_v5 = vld [vmem:[#allocation2] sm:$0xff] }
  0xa3   :  { %v46_v6 = vpop.xlane.xlu0 %45 }
  0xa4   :  { %v47_v7 = vadd.f32 %v46_v6, %v35_v5 }
  0xa6   :  { %49 = vst.msk [vmem:[#allocation2] sm:$0xff] %vm31_vm0, %v47_v7 }
  0xad   :  { %v53_v9 = vld [vmem:[#allocation2] sm:$0xff] }
  0xae   :  { %v56_v10 = vadd.f32 %v55_v8, %v53_v9 }
  0xb0   :  { %v57_v11 = vsub.f32 0.0, %v56_v10 }
  0xb2   :  { %v58_v12 = vmul.f32 1.442695, %v57_v11 }
  0xb4   :  { %72 = vpow2.f32 %v58_v12 }
  0xbe   :  { %v73_v13 = vpop.eup %72 }
  0xbf   :  { %v60_v14 = vadd.f32 1.0, %v73_v13 }
  0xc1   :  { %74 = vrcp.f32 %v60_v14 }
  0xcb   :  { %v75_v15 = vpop.eup %74 }
  0xcc   :  { %63 = vst.msk [vmem:[%s149_s3] sm:$0xff] %vm31_vm0, %v75_v15 }
  0xcd   :  { %68 = vsyncpa [#allocation5], 1 }

</bundles_post_ra>
